<compile_context>
chip_gen: v7x
topology: tpu7x:2x2x1
jax: 0.10.0
libtpu: 0.0.40
codegen_flags: <defaults>
</compile_context>

<pallas_src>
import jax
import jax.numpy as jnp
from jax.experimental import pallas as pl
from jax.experimental.pallas import tpu as pltpu

IN_FEATURES = 28 * 28   # 784 (multiple of 8; Mosaic handles the non-128 lane remainder)
HIDDEN = 128
OUT_FEATURES = 10


def _round_up(a, m):
    return (a + m - 1) // m * m


def mlp_kernel(x_ref, w1_ref, b1_ref, w2_ref, b2_ref, o_ref):
    # x_ref : (TB, 784)  f32   (streamed per grid step; cast to bf16 here, not in wrapper)
    # w1_ref: (784, 128) bf16  (resident)    b1_ref: (1, 128) f32
    # w2_ref: (128, 10)  bf16  (resident)    b2_ref: (1, 10)  f32
    # o_ref : (TB, 10)   f32
    x = x_ref[...].astype(jnp.bfloat16)
    h = jnp.dot(x, w1_ref[...], preferred_element_type=jnp.float32)     # (TB, 128) f32
    h = jnp.maximum(h + b1_ref[...], 0.0)                               # bias + ReLU in f32
    y = jnp.dot(h.astype(jnp.bfloat16), w2_ref[...],
                preferred_element_type=jnp.float32) + b2_ref[...]       # (TB, 10) f32
    o_ref[...] = y


def simple_model_forward(x, w1, b1, w2, b2, *, tb=2048):
    """x: any shape reshapable to (-1, 784). Returns (B, 10) float32 logits."""
    x2d = x.reshape(-1, IN_FEATURES).astype(jnp.float32)
    B = x2d.shape[0]

    # Pad rows only up to a sublane multiple (8), and only when actually needed.
    B8 = _round_up(B, 8)
    if B8 != B:
        x2d = jnp.pad(x2d, ((0, B8 - B), (0, 0)))

    # Batch tile: multiple of 8, at most `tb`, and for large B at most ~half the batch so
    # the grid has >= 2 tiles (keeps both v7x TensorCores busy; harmless on v5e/v6e).
    tb = max(8, _round_up(tb, 8))
    TB = max(8, min(tb, _round_up((B + 1) // 2, 8)))
    nb = pl.cdiv(B8, TB)

    # Weights/biases are tiny; one-time wrapper cast, then VMEM-resident in the kernel.
    w1b = w1.astype(jnp.bfloat16)                           # (784, 128)
    b1f = b1.reshape(1, HIDDEN).astype(jnp.float32)         # (1, 128)
    w2b = w2.astype(jnp.bfloat16)                           # (128, 10)
    b2f = b2.reshape(1, OUT_FEATURES).astype(jnp.float32)   # (1, 10)

    out = pl.pallas_call(
        mlp_kernel,
        out_shape=jax.ShapeDtypeStruct((B, OUT_FEATURES), jnp.float32),
        grid_spec=pltpu.PrefetchScalarGridSpec(
            num_scalar_prefetch=0,
            grid=(nb,),
            in_specs=[
                pl.BlockSpec((TB, IN_FEATURES), lambda i: (i, 0)),       # x tile (streamed)
                pl.BlockSpec((IN_FEATURES, HIDDEN), lambda i: (0, 0)),   # w1 (resident)
                pl.BlockSpec((1, HIDDEN), lambda i: (0, 0)),             # b1 (resident)
                pl.BlockSpec((HIDDEN, OUT_FEATURES), lambda i: (0, 0)),  # w2 (resident)
                pl.BlockSpec((1, OUT_FEATURES), lambda i: (0, 0)),       # b2 (resident)
            ],
            out_specs=pl.BlockSpec((TB, OUT_FEATURES), lambda i: (i, 0)),
        ),
        compiler_params=pltpu.CompilerParams(
            dimension_semantics=("parallel",),        # batch tiles shard across TCs on v7x
            vmem_limit_bytes=48 * 1024 * 1024,        # headroom for TB=2048 double-buffering
        ),
    )(x2d, w1b, b1f, w2b, b2f)

    return out


def init_params(key):
    """Deterministic init mirroring nn.Linear's U(-1/sqrt(fan_in), 1/sqrt(fan_in))."""
    k1, k2, k3, k4 = jax.random.split(key, 4)
    bound1 = 1.0 / jnp.sqrt(jnp.float32(IN_FEATURES))
    bound2 = 1.0 / jnp.sqrt(jnp.float32(HIDDEN))
    # stored as (in, out) == transpose of PyTorch's (out, in) weight layout
    w1 = jax.random.uniform(k1, (IN_FEATURES, HIDDEN), jnp.float32, -bound1, bound1)
    b1 = jax.random.uniform(k2, (HIDDEN,), jnp.float32, -bound1, bound1)
    w2 = jax.random.uniform(k3, (HIDDEN, OUT_FEATURES), jnp.float32, -bound2, bound2)
    b2 = jax.random.uniform(k4, (OUT_FEATURES,), jnp.float32, -bound2, bound2)
    return w1, b1, w2, b2


if __name__ == "__main__":
    key = jax.random.PRNGKey(0)
    kx, kp = jax.random.split(key)
    # small MNIST-like batch: (B, 1, 28, 28) — forward flattens to (B, 784)
    x = jax.random.normal(kx, (2, 1, 28, 28), jnp.float32)
    w1, b1, w2, b2 = init_params(kp)

    out = simple_model_forward(x, w1, b1, w2, b2)
    out = jax.block_until_ready(out)
    assert out.shape == (2, OUT_FEATURES)

    # Reference that mirrors the kernel's bf16-input / f32-accumulate numerics.
    xb = x.reshape(-1, IN_FEATURES).astype(jnp.bfloat16).astype(jnp.float32)
    w1b = w1.astype(jnp.bfloat16).astype(jnp.float32)
    w2b = w2.astype(jnp.bfloat16).astype(jnp.float32)
    h_ref = jnp.maximum(xb @ w1b + b1, 0.0).astype(jnp.bfloat16).astype(jnp.float32)
    ref_bf16 = h_ref @ w2b + b2
    assert jnp.allclose(out, ref_bf16, atol=2e-2, rtol=2e-2)

    # Sanity against the pure f32 reference (looser: bf16 rounding of x / h / weights).
    ref_f32 = jnp.maximum(x.reshape(-1, IN_FEATURES) @ w1 + b1, 0.0) @ w2 + b2
    assert jnp.allclose(out, ref_f32, atol=5e-2, rtol=5e-2)

    print("KERNEL_OK")
</pallas_src>

<mosaic_0001>
module attributes {stable_mosaic.version = 11 : i64} {
  func.func @mlp_kernel(%arg0: i32, %arg1: memref<8x784xf32, #tpu.memory_space<vmem>>, %arg2: memref<784x128xbf16, #tpu.memory_space<vmem>>, %arg3: memref<1x128xf32, #tpu.memory_space<vmem>>, %arg4: memref<128x10xbf16, #tpu.memory_space<vmem>>, %arg5: memref<1x10xf32, #tpu.memory_space<vmem>>, %arg6: memref<8x10xf32, #tpu.memory_space<vmem>>) attributes {dimension_semantics = [#tpu.dimension_semantics<parallel>], iteration_bounds = array<i64: 1>, scalar_prefetch = 0 : i64, scratch_operands = 0 : i64, tpu.core_type = #tpu.core_type<tc>, window_params = [{transform_indices = @transform_0, window_bounds = array<i64: 8, 784>}, {pipeline_mode = #tpu.pipeline_mode<synchronous>, transform_indices = @transform_1, window_bounds = array<i64: 784, 128>}, {pipeline_mode = #tpu.pipeline_mode<synchronous>, transform_indices = @transform_2, window_bounds = array<i64: 1, 128>}, {pipeline_mode = #tpu.pipeline_mode<synchronous>, transform_indices = @transform_3, window_bounds = array<i64: 128, 10>}, {pipeline_mode = #tpu.pipeline_mode<synchronous>, transform_indices = @transform_4, window_bounds = array<i64: 1, 10>}, {transform_indices = @transform_5, window_bounds = array<i64: 8, 10>}]} {
    %c0 = arith.constant 0 : index
    %c0_0 = arith.constant 0 : index
    %0 = vector.load %arg1[%c0, %c0_0] : memref<8x784xf32, #tpu.memory_space<vmem>>, vector<8x784xf32>
    %1 = arith.truncf %0 : vector<8x784xf32> to vector<8x784xbf16>
    %c0_1 = arith.constant 0 : index
    %c0_2 = arith.constant 0 : index
    %2 = vector.load %arg2[%c0_1, %c0_2] : memref<784x128xbf16, #tpu.memory_space<vmem>>, vector<784x128xbf16>
    %cst = arith.constant dense<0.000000e+00> : vector<8x128xf32>
    %3 = tpu.matmul %1, %2, %cst {dimension_numbers = #tpu.dot_dimension_numbers<[1], [0], [0], [1], [0, 0, 1, 1], [], []>} : vector<8x784xbf16>, vector<784x128xbf16>, vector<8x128xf32> -> vector<8x128xf32>
    %c0_3 = arith.constant 0 : index
    %c0_4 = arith.constant 0 : index
    %4 = vector.load %arg3[%c0_3, %c0_4] : memref<1x128xf32, #tpu.memory_space<vmem>>, vector<1x128xf32>
    %5 = vector.broadcast %4 : vector<1x128xf32> to vector<8x128xf32>
    %6 = arith.addf %3, %5 : vector<8x128xf32>
    %cst_5 = arith.constant 0.000000e+00 : f32
    %7 = vector.broadcast %cst_5 : f32 to vector<8x128xf32>
    %8 = arith.maximumf %6, %7 : vector<8x128xf32>
    %9 = arith.truncf %8 : vector<8x128xf32> to vector<8x128xbf16>
    %c0_6 = arith.constant 0 : index
    %c0_7 = arith.constant 0 : index
    %10 = vector.load %arg4[%c0_6, %c0_7] : memref<128x10xbf16, #tpu.memory_space<vmem>>, vector<128x10xbf16>
    %cst_8 = arith.constant dense<0.000000e+00> : vector<8x10xf32>
    %11 = tpu.matmul %9, %10, %cst_8 {dimension_numbers = #tpu.dot_dimension_numbers<[1], [0], [0], [1], [0, 0, 1, 1], [], []>} : vector<8x128xbf16>, vector<128x10xbf16>, vector<8x10xf32> -> vector<8x10xf32>
    %c0_9 = arith.constant 0 : index
    %c0_10 = arith.constant 0 : index
    %12 = vector.load %arg5[%c0_9, %c0_10] : memref<1x10xf32, #tpu.memory_space<vmem>>, vector<1x10xf32>
    %13 = vector.broadcast %12 : vector<1x10xf32> to vector<8x10xf32>
    %14 = arith.addf %11, %13 : vector<8x10xf32>
    %c0_11 = arith.constant 0 : index
    %c0_12 = arith.constant 0 : index
    %15 = vector.load %arg6[%c0_11, %c0_12] : memref<8x10xf32, #tpu.memory_space<vmem>>, vector<8x10xf32>
    tpu.vector_store %arg6[%c0_11, %c0_12], %14 {strides = array<i32>} : memref<8x10xf32, #tpu.memory_space<vmem>>, vector<8x10xf32>,
    return
  }
  func.func @transform_0(%arg0: i32) -> (i32, i32) {
    %c0_i32 = arith.constant 0 : i32
    %c0_i32_0 = arith.constant 0 : i32
    return %arg0, %c0_i32 : i32, i32
  }
  func.func @transform_1(%arg0: i32) -> (i32, i32) {
    %c0_i32 = arith.constant 0 : i32
    %c0_i32_0 = arith.constant 0 : i32
    %c0_i32_1 = arith.constant 0 : i32
    return %c0_i32, %c0_i32_0 : i32, i32
  }
  func.func @transform_2(%arg0: i32) -> (i32, i32) {
    %c0_i32 = arith.constant 0 : i32
    %c0_i32_0 = arith.constant 0 : i32
    %c0_i32_1 = arith.constant 0 : i32
    return %c0_i32, %c0_i32_0 : i32, i32
  }
  func.func @transform_3(%arg0: i32) -> (i32, i32) {
    %c0_i32 = arith.constant 0 : i32
    %c0_i32_0 = arith.constant 0 : i32
    %c0_i32_1 = arith.constant 0 : i32
    return %c0_i32, %c0_i32_0 : i32, i32
  }
  func.func @transform_4(%arg0: i32) -> (i32, i32) {
    %c0_i32 = arith.constant 0 : i32
    %c0_i32_0 = arith.constant 0 : i32
    %c0_i32_1 = arith.constant 0 : i32
    return %c0_i32, %c0_i32_0 : i32, i32
  }
  func.func @transform_5(%arg0: i32) -> (i32, i32) {
    %c0_i32 = arith.constant 0 : i32
    %c0_i32_0 = arith.constant 0 : i32
    return %arg0, %c0_i32 : i32, i32
  }
}

</mosaic_0001>

<bundles_post_ra>
// kernel: tpu_custom_call.1
= control target key start
LH: loop header
LB: loop body
LE: loop exit
PB: predicated region body
PF: predicated region fallthrough
CT: control target
= control target key end

     0   :  { %10 = vsyncpa [#allocation3], 0  ;;  %s1147_s0 = inlined_call_operand.vmem [shape: f32[8,784], index: 0, kind: input, shape index: {}]   ;;  %s1148_s1 = inlined_call_operand.hbm [shape: bf16[784,128], index: 1, kind: input, shape index: {}]   ;;  %s1149_s2 = inlined_call_operand.vmem [shape: f32[1,128], index: 2, kind: input, shape index: {}]   ;;  %s1150_s3 = inlined_call_operand.vmem [shape: bf16[128,10], index: 3, kind: input, shape index: {}]   ;;  %s1151_s4 = inlined_call_operand.vmem [shape: f32[1,10], index: 4, kind: input, shape index: {}]   ;;  %s1152_s5 = inlined_call_operand.hbm [shape: f32[2,10], index: 5, kind: output, shape index: {}]  }
   0x1   :  { %11 = vsyncpa [#allocation4], 0  ;;  %s1021_s18 = smov [#allocation2]   ;;  %s973_s22 = scalar_lea.hbm %s1148_s1, 6272 }
   0x2   :  { %s19_s19 = sshll.u32 %s1021_s18, 4  ;;  %p974_p0 = scmp.ne.s32.totalorder %s1148_s1, %s973_s22  ;;  %s20_s19 = int_to_ptr.vmem [resolvable:$true] %s19_s19 }
   0x3   :  { %p977_p1 = scmp.lt.u32.totalorder %s973_s22, %s1148_s1 }
   0x5   :  { %p979_p2 = pnand %p977_p1, %p974_p0 }
   0x7   :  { %982 = shalt.err (!%p979_p2)
}
   0x8   :  { %s983_s27 = scalar_lea.vmem %s20_s19, 6272  ;;  %p988_p4 = scmp.lt.s32.totalorder %s20_s19, %s20_s19 }
   0x9   :  { %p984_p3 = scmp.ne.s32.totalorder %s20_s19, %s983_s27  ;;  %p989_p5 = scmp.lt.s32.totalorder %s983_s27, %s983_s27 }
   0xb   :  { %p990_p6 = por %p989_p5, %p988_p4 }
   0xd   :  { %p991_p7 = pnand %p990_p6, %p984_p3 }
   0xf   :  { %994 = shalt.err (!%p991_p7)
}
  0x10   :  { %s1022_s28 = smov 64   ;;  %s1023_s29 = smov 4  }
  0x11   :  { %25 = dma.hbm_to_vmem [thread:$0]  %s1148_s1, 6272, %s20_s19, [#allocation3], %s1022_s28, %s1022_s28, %s1023_s29  }
  0x12   :  { %1017 = dma.done.wait [#allocation3], 6272  }
  0x13   :  { %1018 = vsyncadd [#allocation3], 4294961024  ;;  %v916_v0 = vld [vmem:[#allocation2 + $0x40] sm:$0xff]   ;;  %v920_v4 = vld [vmem:[#allocation2 + $0x48] sm:$0xff]   ;;  %v1024_v44 = vmov 0.0   ;;  %vm1025_vm0 = vmmov 0  }
  0x14   :  { %v917_v1 = vld [vmem:[#allocation2] sm:$0xff]   ;;  %805 = vmatprep.subr.bf16.mxu0 %v916_v0  ;;  %v921_v5 = vld [vmem:[#allocation2 + $0x8] sm:$0xff]   ;;  %v924_v8 = vld [vmem:[#allocation2 + $0x50] sm:$0xff]   ;;  %vm449_vm1 = vcmask 130048   ;;  %vm726_vm2 = vcmask 80896  }
  0x15   :  { %v918_v2 = vld [vmem:[#allocation2 + $0xc0] sm:$0xff]   ;;  %806 = vmatpush3.bf16.msra.mxu0 %v917_v1  ;;  %v922_v6 = vld [vmem:[#allocation2 + $0xc8] sm:$0xff]   ;;  %v925_v9 = vld [vmem:[#allocation2 + $0x10] sm:$0xff]  }
  0x16   :  { %v919_v3 = vld [vmem:[#allocation2 + $0x80] sm:$0xff]   ;;  %827 = vmatprep.subr.bf16.mxu1 %v918_v2  ;;  %807 = vmatprep.subr.bf16.mxu0 %v920_v4  ;;  %v923_v7 = vld [vmem:[#allocation2 + $0x88] sm:$0xff]   ;;  %v926_v10 = vld [vmem:[#allocation2 + $0xd0] sm:$0xff]  }
  0x17   :  { %828 = vmatpush3.bf16.msra.mxu1 %v919_v3  ;;  %v927_v11 = vld [vmem:[#allocation2 + $0x90] sm:$0xff]   ;;  %v928_v12 = vld [vmem:[#allocation2 + $0x58] sm:$0xff]   ;;  %v932_v16 = vld [vmem:[#allocation2 + $0x60] sm:$0xff]  }
  0x18   :  { %829 = vmatprep.subr.bf16.mxu1 %v922_v6  ;;  %v929_v13 = vld [vmem:[#allocation2 + $0x18] sm:$0xff]   ;;  %v933_v17 = vld [vmem:[#allocation2 + $0x20] sm:$0xff]   ;;  %v936_v20 = vld [vmem:[#allocation2 + $0x68] sm:$0xff]  }
  0x19   :  { %808 = vmatpush3.bf16.msra.mxu0 %v921_v5  ;;  %v930_v14 = vld [vmem:[#allocation2 + $0xd8] sm:$0xff]   ;;  %v934_v18 = vld [vmem:[#allocation2 + $0xe0] sm:$0xff]   ;;  %v937_v21 = vld [vmem:[#allocation2 + $0x28] sm:$0xff]  }
  0x1a   :  { %809 = vmatprep.subr.bf16.mxu0 %v924_v8  ;;  %v931_v15 = vld [vmem:[#allocation2 + $0x98] sm:$0xff]   ;;  %v935_v19 = vld [vmem:[#allocation2 + $0xa0] sm:$0xff]   ;;  %v938_v22 = vld [vmem:[#allocation2 + $0xe8] sm:$0xff]  }
  0x1b   :  { %830 = vmatpush3.bf16.msra.mxu1 %v923_v7  ;;  %v939_v23 = vld [vmem:[#allocation2 + $0xa8] sm:$0xff]   ;;  %v940_v24 = vld [vmem:[#allocation2 + $0x70] sm:$0xff]   ;;  %v944_v28 = vld [vmem:[#allocation2 + $0x78] sm:$0xff]  }
  0x1c   :  { %831 = vmatprep.subr.bf16.mxu1 %v926_v10  ;;  %v941_v25 = vld [vmem:[#allocation2 + $0x30] sm:$0xff]   ;;  %v945_v29 = vld [vmem:[#allocation2 + $0x38] sm:$0xff]   ;;  %v37_v31 = vld [vmem:[%s1147_s0 + $0x8] sm:$0xff] }
  0x1d   :  { %810 = vmatpush3.bf16.msra.mxu0 %v925_v9  ;;  %v942_v26 = vld [vmem:[#allocation2 + $0xf0] sm:$0xff]   ;;  %v946_v30 = vld [vmem:[#allocation2 + $0xf8] sm:$0xff]   ;;  %v44_v32 = vpack.c.bf16 %v37_v31, %v37_v31  ;;  %v36_v34 = vld [vmem:[%s1147_s0] sm:$0xff] }
  0x1e   :  { %811 = vmatprep.subr.bf16.mxu0 %v928_v12  ;;  %v943_v27 = vld [vmem:[#allocation2 + $0xb0] sm:$0xff]   ;;  %v947_v33 = vld [vmem:[#allocation2 + $0xb8] sm:$0xff]   ;;  %v43_v35 = vpack.c.bf16 %v36_v34, %v36_v34  ;;  %v948_v36 = vld [vmem:[#allocation2 + $0x140] sm:$0xff]  }
  0x1f   :  { %832 = vmatpush3.bf16.msra.mxu1 %v927_v11  ;;  %v39_v37 = vld [vmem:[%s1147_s0 + $0x18] sm:$0xff]  ;;  %485 = vmatprep.mubr.bf16.mxu0 %v44_v32  ;;  %v949_v39 = vld [vmem:[#allocation2 + $0x100] sm:$0xff]   ;;  %v38_v40 = vld [vmem:[%s1147_s0 + $0x10] sm:$0xff] }
  0x20   :  { %833 = vmatprep.subr.bf16.mxu1 %v930_v14  ;;  %v46_v38 = vpack.c.bf16 %v39_v37, %v39_v37  ;;  %v45_v41 = vpack.c.bf16 %v38_v40, %v38_v40  ;;  %v950_v42 = vld [vmem:[#allocation2 + $0x148] sm:$0xff]   ;;  %v952_v45 = vld [vmem:[#allocation2 + $0x150] sm:$0xff]   ;;  %v954_v47 = vld [vmem:[#allocation2 + $0x158] sm:$0xff]  }
  0x21   :  { %812 = vmatpush3.bf16.msra.mxu0 %v929_v13  ;;  %v951_v43 = vld [vmem:[#allocation2 + $0x108] sm:$0xff]   ;;  %v953_v46 = vld [vmem:[#allocation2 + $0x110] sm:$0xff]   ;;  %v955_v48 = vld [vmem:[#allocation2 + $0x118] sm:$0xff]  }
  0x22   :  { %813 = vmatprep.subr.bf16.mxu0 %v932_v16  ;;  %525 = vmatprep.mubr.bf16.mxu1 %v46_v38  ;;  %v956_v49 = vld [vmem:[#allocation2 + $0x160] sm:$0xff]   ;;  %v958_v51 = vld [vmem:[#allocation2 + $0x168] sm:$0xff]   ;;  %v960_v55 = vld [vmem:[#allocation2 + $0x170] sm:$0xff]  }
  0x23   :  { %834 = vmatpush3.bf16.msra.mxu1 %v931_v15  ;;  %v957_v50 = vld [vmem:[#allocation2 + $0x120] sm:$0xff]   ;;  %v959_v52 = vld [vmem:[#allocation2 + $0x128] sm:$0xff]   ;;  %v42_v57 = vld [vmem:[%s1147_s0 + $0x30] sm:$0xff] }
  0x24   :  { %835 = vmatprep.subr.bf16.mxu1 %v934_v18  ;;  %v964_v53 = vld [vmem:[#allocation2 + $0x180] sm:$0xff]   ;;  %v41_v54 = vld [vmem:[%s1147_s0 + $0x28] sm:$0xff]  ;;  %v49_v58 = vpack.c.bf16 %v42_v57, %v42_v57  ;;  %v961_v59 = vld [vmem:[#allocation2 + $0x130] sm:$0xff]  }
  0x25   :  { %814 = vmatpush3.bf16.msra.mxu0 %v933_v17  ;;  %v48_v56 = vpack.c.bf16 %v41_v54, %v41_v54  ;;  %v962_v60 = vld [vmem:[#allocation2 + $0x178] sm:$0xff]   ;;  %v40_v62 = vld [vmem:[%s1147_s0 + $0x20] sm:$0xff]  ;;  %v966_v1 = vld [vmem:[%s1150_s3 + $0x8] sm:$0xff]  }
  0x26   :  { %815 = vmatprep.subr.bf16.mxu0 %v936_v20  ;;  %v963_v61 = vld [vmem:[#allocation2 + $0x138] sm:$0xff]   ;;  %v47_v63 = vpack.c.bf16 %v40_v62, %v40_v62  ;;  %v965_v0 = vld [vmem:[%s1150_s3] sm:$0xff]   ;;  %v967_v2 = vld [vmem:[%s1150_s3 + $0x10] sm:$0xff]  }
  0x27   :  { %836 = vmatpush3.bf16.msra.mxu1 %v935_v19  ;;  %v968_v3 = vld [vmem:[%s1150_s3 + $0x18] sm:$0xff]   ;;  %v969_v4 = vld [vmem:[%s1150_s3 + $0x20] sm:$0xff]   ;;  %v970_v5 = vld [vmem:[%s1150_s3 + $0x28] sm:$0xff]  }
  0x28   :  { %837 = vmatprep.subr.bf16.mxu1 %v938_v22  ;;  %v971_v6 = vld [vmem:[%s1150_s3 + $0x30] sm:$0xff]   ;;  %v972_v7 = vld [vmem:[%s1150_s3 + $0x38] sm:$0xff]   ;;  %v745_v9 = vld [vmem:[%s1149_s2] ss:$0 sm:$0xff] }
  0x29   :  { %816 = vmatpush3.bf16.msra.mxu0 %v937_v21  ;;  %v796_v34 = vld [vmem:[%s1151_s4] ss:$0 sm:$0xff] }
  0x2a   :  { %817 = vmatprep.subr.bf16.mxu0 %v940_v24 }
  0x2b   :  { %838 = vmatpush3.bf16.msra.mxu1 %v939_v23 }
  0x2c   :  { %839 = vmatprep.subr.bf16.mxu1 %v942_v26 }
  0x2d   :  { %818 = vmatpush3.bf16.msra.mxu0 %v941_v25 }
  0x2e   :  { %819 = vmatprep.subr.bf16.mxu0 %v944_v28 }
  0x2f   :  { %840 = vmatpush3.bf16.msra.mxu1 %v943_v27 }
  0x30   :  { %841 = vmatprep.subr.bf16.mxu1 %v946_v30 }
  0x31   :  { %820 = vmatpush3.bf16.msra.mxu0 %v945_v29 }
  0x32   :  { %849 = vmatprep.subr.bf16.mxu0 %v948_v36 }
  0x33   :  { %842 = vmatpush3.bf16.msra.mxu1 %v947_v33 }
  0x34   :  { %486 = vmatmul.mubr.bf16.vlgmr.msra.gmra.mrb[0].mxu0 %v43_v35  ;;  %882 = vmatprep.subr.bf16.mxu1 %v1024_v44 }
  0x35   :  { %850 = vmatpush3.bf16.msra.mxu0 %v949_v39  ;;  %565 = vmatprep.mubr.bf16.mxu0 %v48_v56 }
  0x36   :  { %526 = vmatmul.mubr.bf16.vlgmr.msra.gmra.mrb[0].mxu1 %v45_v41  ;;  %851 = vmatprep.subr.bf16.mxu0 %v950_v42 }
  0x37   :  { %884 = vmatprep.mubr.msk.bf16.mxu1 %vm1025_vm0, %v1024_v44  ;;  %883 = vmatpush3.bf16.msra.mxu1 %v964_v53 }
  0x38   :  { %888 = vmatprep.subr.bf16.mxu1 %v1024_v44 }
  0x39   :  { %852 = vmatpush3.bf16.msra.mxu0 %v951_v43 }
  0x3a   :  { %853 = vmatprep.subr.bf16.mxu0 %v952_v45 }
  0x3d   :  { %854 = vmatpush3.bf16.msra.mxu0 %v953_v46 }
  0x3e   :  { %855 = vmatprep.subr.bf16.mxu0 %v954_v47  ;;  %885 = vmatmul.mubr.msk.bf16.vlgmr.msra.gmra.mrb[4].mxu1 %vm449_vm1, %v49_v58 }
  0x3f   :  { %904 = vmatprep.mubr.msk.bf16.mxu1 %vm1025_vm0, %v1024_v44  ;;  %889 = vmatpush3.bf16.msra.mxu1 %v965_v0 }
  0x40   :  { %890 = vmatprep.subr.bf16.mxu1 %v1024_v44 }
  0x41   :  { %856 = vmatpush3.bf16.msra.mxu0 %v955_v48 }
  0x42   :  { %857 = vmatprep.subr.bf16.mxu0 %v956_v49 }
  0x43   :  { %891 = vmatpush3.bf16.msra.mxu1 %v966_v1 }
  0x44   :  { %892 = vmatprep.subr.bf16.mxu1 %v1024_v44 }
  0x45   :  { %858 = vmatpush3.bf16.msra.mxu0 %v957_v50 }
  0x46   :  { %859 = vmatprep.subr.bf16.mxu0 %v958_v51 }
  0x47   :  { %893 = vmatpush3.bf16.msra.mxu1 %v967_v2 }
  0x48   :  { %894 = vmatprep.subr.bf16.mxu1 %v1024_v44 }
  0x49   :  { %860 = vmatpush3.bf16.msra.mxu0 %v959_v52 }
  0x4a   :  { %861 = vmatprep.subr.bf16.mxu0 %v960_v55 }
  0x4b   :  { %895 = vmatpush3.bf16.msra.mxu1 %v968_v3 }
  0x4c   :  { %896 = vmatprep.subr.bf16.mxu1 %v1024_v44 }
  0x4d   :  { %862 = vmatpush3.bf16.msra.mxu0 %v961_v59 }
  0x4e   :  { %863 = vmatprep.subr.bf16.mxu0 %v962_v60 }
  0x4f   :  { %897 = vmatpush3.bf16.msra.mxu1 %v969_v4 }
  0x50   :  { %898 = vmatprep.subr.bf16.mxu1 %v1024_v44 }
  0x51   :  { %864 = vmatpush3.bf16.msra.mxu0 %v963_v61 }
  0x53   :  { %899 = vmatpush3.bf16.msra.mxu1 %v970_v5 }
  0x54   :  { %566 = vmatmul.mubr.bf16.vlgmr.msra.gmra.mrb[4].mxu0 %v47_v63  ;;  %900 = vmatprep.subr.bf16.mxu1 %v1024_v44 }
  0x57   :  { %901 = vmatpush3.bf16.msra.mxu1 %v971_v6 }
  0x58   :  { %902 = vmatprep.subr.bf16.mxu1 %v1024_v44 }
  0x5b   :  { %903 = vmatpush3.bf16.msra.mxu1 %v972_v7 }
 0x107   :  { %v821_v8 = vpop.f32.mrb[0].mxu0 }
 0x108   :  { %v822_v10 = vpop.f32.mrb[1].mxu0 }
 0x109   :  { %v823_v11 = vadd.f32 %v822_v10, %v821_v8  ;;  %v824_v12 = vpop.f32.mrb[2].mxu0  ;;  %v843_v13 = vpop.f32.mrb[0].mxu1 }
 0x10a   :  { %v825_v14 = vpop.f32.mrb[3].mxu0  ;;  %v844_v16 = vpop.f32.mrb[1].mxu1 }
 0x10b   :  { %v488_v15 = vadd.f32 %v823_v11, %v745_v9  ;;  %v845_v17 = vadd.f32 %v844_v16, %v843_v13  ;;  %v846_v18 = vpop.f32.mrb[2].mxu1 }
 0x10c   :  { %v847_v19 = vpop.f32.mrb[3].mxu1 }
 0x10d   :  { %v528_v20 = vadd.f32 %v845_v17, %v488_v15 }
 0x111   :  { %v607_v21 = vpop.f32.mrb[4].mxu1 }
 0x112   :  { %v886_v22 = vpop.f32.mrb[5].mxu1 }
 0x113   :  { %v610_v23 = vpop.f32.mrb[6].mxu1 }
 0x114   :  { %v887_v24 = vpop.f32.mrb[7].mxu1 }
 0x127   :  { %v865_v25 = vpop.f32.mrb[4].mxu0 }
 0x128   :  { %v866_v26 = vpop.f32.mrb[5].mxu0 }
 0x129   :  { %v867_v27 = vadd.f32 %v866_v26, %v865_v25  ;;  %v868_v28 = vpop.f32.mrb[6].mxu0 }
 0x12a   :  { %v869_v29 = vpop.f32.mrb[7].mxu0 }
 0x12b   :  { %v568_v30 = vadd.f32 %v867_v27, %v528_v20 }
 0x12d   :  { %v608_v31 = vadd.f32 %v607_v21, %v568_v30 }
 0x12f   :  { %v613_v32 = vmax.f32 %v608_v31, 0.0 }
 0x131   :  { %v614_v33 = vpack.c.bf16 %v613_v32, %v613_v32 }
 0x133   :  { %905 = vmatmul.mubr.bf16.vlgmr.msra.gmra.mrb[8].mxu1 %v614_v33 }
 0x206   :  { %v720_v35 = vpop.f32.mrb[8].mxu1 }
 0x207   :  { %v721_v36 = vadd.f32 %v796_v34, %v720_v35  ;;  %v906_v37 = vpop.f32.mrb[9].mxu1 }
 0x208   :  { %v723_v38 = vpop.f32.mrb[10].mxu1 }
 0x209   :  { %727 = vst.msk [vmem:[#allocation5] sm:$0xff] %vm726_vm2, %v721_v36  ;;  %v907_v39 = vpop.f32.mrb[11].mxu1 }
 0x20a   :  { %732 = vsyncadd [#allocation4], 96  ;;  %s1026_s11 = smov [#allocation5]  }
 0x20b   :  { %s733_s12 = sshll.u32 %s1026_s11, 4  ;;  %s734_s12 = int_to_ptr.vmem [resolvable:$true] %s733_s12 }
 0x20c   :  { %s995_s13 = scalar_lea.vmem %s734_s12, 32  ;;  %s999_s14 = scalar_lea.vmem %s734_s12, 128 }
 0x20d   :  { %p996_p8 = scmp.ne.s32.totalorder %s734_s12, %s995_s13  ;;  %p1000_p9 = scmp.lt.s32.totalorder %s734_s12, %s734_s12 }
 0x20e   :  { %p1001_p10 = scmp.lt.s32.totalorder %s999_s14, %s995_s13 }
 0x210   :  { %p1002_p11 = por %p1001_p10, %p1000_p9 }
 0x212   :  { %p1003_p12 = pnand %p1002_p11, %p996_p8 }
 0x214   :  { %1006 = shalt.err (!%p1003_p12)
}
 0x215   :  { %s1007_s16 = scalar_lea.hbm %s1152_s5, 32 }
 0x216   :  { %p1008_p13 = scmp.ne.s32.totalorder %s1152_s5, %s1007_s16  ;;  %p1011_p0 = scmp.lt.u32.totalorder %s1007_s16, %s1152_s5 }
 0x218   :  { %p1013_p1 = pnand %p1011_p0, %p1008_p13 }
 0x21a   :  { %1016 = shalt.err (!%p1013_p1)
}
 0x21b   :  { %s1027_s21 = smov 32   ;;  %s1028_s22 = smov 2  }
 0x21c   :  { %739 = dma.vmem_to_hbm [thread:$0]  %s734_s12, 32, %s1152_s5, [#allocation4], %s1027_s21, %s1027_s21, %s1028_s22  }
 0x21d   :  { %1019 = dma.done.wait [#allocation4], 128  }
 0x21e   :  { %1020 = vsyncadd [#allocation4], 4294967168 }
 0x21f   :  { %743 = vsyncpa [#allocation3], 1 }
 0x220   :  { %744 = vsyncpa [#allocation4], 1 }

</bundles_post_ra>
